<compile_context>
chip_gen: v5e
topology: v5e:2x2
jax: 0.10.0
libtpu: 0.0.40
codegen_flags: <defaults>
</compile_context>

<pallas_src>
import functools

import jax
import jax.numpy as jnp
from jax.experimental import pallas as pl
from jax.experimental.pallas import tpu as pltpu


def _conv_bn_silu_kernel(x_ref, r_ref, shift_ref, o_ref, *,
                         k, stride, ho, hq, kpad):
    """Fused conv + folded-BN + SiLU for a block of `bn` images.

    x_ref     : (bn, stride*Hq, Kpad)  bf16  phase-major padded rows, lane-padded
    r_ref     : (k*Kpad, Wo*C2)        bf16  banded weights (BN scale folded), resident
    shift_ref : (1, Wo*C2)             f32   BN shift tiled along output columns
    o_ref     : (bn, Ho, Wo*C2)        f32
    """
    bn = x_ref.shape[0]
    nout = r_ref.shape[1]

    # Slice the k row-shifted bf16 windows straight off the VMEM ref (no f32
    # upcast pass) and fuse them into ONE MXU GEMM: concatenate along the
    # lane-aligned contraction dim (Kpad % 128 == 0), flatten (bn, Ho) into the
    # M dim so the systolic array rows are filled.
    pieces = []
    for dy in range(k):                                   # k is static -> unrolled
        start = (dy % stride) * hq + dy // stride         # contiguous phase-major window
        pieces.append(x_ref[:, start:start + ho, :])      # (bn, Ho, Kpad) bf16
    lhs = pieces[0] if k == 1 else jnp.concatenate(pieces, axis=-1)
    lhs2 = lhs.reshape(bn * ho, k * kpad)                 # (M, K) with M = bn*Ho

    acc = jnp.dot(lhs2, r_ref[...],
                  preferred_element_type=jnp.float32)     # (bn*Ho, Wo*C2) f32
    y = acc + shift_ref[...]                              # folded BatchNorm shift
    y = y * jax.nn.sigmoid(y)                             # SiLU
    o_ref[...] = y.reshape(bn, ho, nout).astype(o_ref.dtype)


def _largest_batch_block(n, ho, target_m=256):
    """Largest divisor of n with bn*Ho <= target_m (fills the MXU M dim)."""
    bn = 1
    for b in range(1, n + 1):
        if n % b == 0 and b * ho <= max(target_m, ho):
            bn = b
    return bn


@functools.partial(jax.jit, static_argnames=("k", "stride", "pad"))
def conv_bn_silu(x_nchw, w_oihw, gamma, beta, run_mean, run_var, *,
                 k, stride, pad, eps=1e-5):
    """Conv2d(bias=False, groups=1, dilation=1) + BatchNorm2d(eval) + SiLU."""
    N, C1, H, W = x_nchw.shape
    C2 = w_oihw.shape[0]
    Hp, Wp = H + 2 * pad, W + 2 * pad
    Ho = (Hp - k) // stride + 1
    Wo = (Wp - k) // stride + 1
    Hq = -(-Hp // stride)                 # rows per stride phase (ceil)
    Kpad = -(-(Wp * C1) // 128) * 128     # lane-aligned per-dy contraction width
    Nout = Wo * C2

    # ---- activation: NCHW -> padded NHWC -> phase-major (N, s*Hq, Kpad) bf16 ----
    # (one HBM pass; the kernel reads the activation exactly once per image)
    x = jnp.transpose(x_nchw, (0, 2, 3, 1))                              # NHWC
    x = jnp.pad(x, ((0, 0),
                    (pad, pad + (stride * Hq - Hp)),                     # rows -> s*Hq
                    (pad, pad),                                          # cols -> Wp
                    (0, 0)))
    # phase-major rows: row (p*Hq + q) holds original padded row (q*stride + p),
    # so the kernel's per-dy window is a contiguous static slice for any stride.
    x = x.reshape(N, Hq, stride, Wp, C1)
    x = jnp.transpose(x, (0, 2, 1, 3, 4)).reshape(N, stride * Hq, Wp * C1)
    x_flat = jnp.pad(x, ((0, 0), (0, 0), (0, Kpad - Wp * C1))).astype(jnp.bfloat16)

    # ---- weights: fold BN scale, build banded RHS, flatten to (k*Kpad, Nout) ----
    scale = gamma * jax.lax.rsqrt(run_var + eps)                         # [C2]
    shift = beta - run_mean * scale                                      # [C2]
    wk = jnp.transpose(w_oihw * scale[:, None, None, None],
                       (2, 3, 1, 0))                                     # [dy, dx, C1, C2]
    w_idx = jnp.arange(Wo)
    rows = ((w_idx[:, None, None] * stride + jnp.arange(k)[None, :, None]) * C1
            + jnp.arange(C1)[None, None, :])                             # [Wo, k, C1]
    cols = w_idx[:, None] * C2 + jnp.arange(C2)[None, :]                 # [Wo, C2]
    r = jnp.zeros((k, Kpad, Nout), jnp.float32)
    r = r.at[:, rows[:, :, :, None], cols[:, None, None, :]].set(
        jnp.broadcast_to(wk[:, None, :, :, :], (k, Wo, k, C1, C2)))
    r = r.reshape(k * Kpad, Nout).astype(jnp.bfloat16)                   # banded RHS

    shift_row = jnp.tile(shift, Wo).reshape(1, Nout).astype(jnp.float32)

    bn = _largest_batch_block(N, Ho)      # images per grid step (M = bn*Ho)

    # VMEM working set at demo sizes: x block ~9 KiB, R ~96 KiB, out ~16 KiB
    # (x2 for double buffering) -- far under the 32 MiB scoped default and
    # v7x's 64 MiB physical VMEM.
    out_flat = pl.pallas_call(
        functools.partial(_conv_bn_silu_kernel, k=k, stride=stride,
                          ho=Ho, hq=Hq, kpad=Kpad),
        out_shape=jax.ShapeDtypeStruct((N, Ho, Nout), jnp.float32),
        grid_spec=pltpu.PrefetchScalarGridSpec(
            num_scalar_prefetch=0,
            grid=(N // bn,),
            in_specs=[
                pl.BlockSpec((bn, stride * Hq, Kpad), lambda n: (n, 0, 0)),
                pl.BlockSpec((k * Kpad, Nout), lambda n: (0, 0)),        # resident
                pl.BlockSpec((1, Nout), lambda n: (0, 0)),               # resident
            ],
            out_specs=pl.BlockSpec((bn, Ho, Nout), lambda n: (n, 0, 0)),
        ),
        compiler_params=pltpu.CompilerParams(
            dimension_semantics=("parallel",)),   # feeds both v7x TensorCores
    )(x_flat, r, shift_row)

    # Back to the module's NCHW contract (free reshape + one transpose).
    out = out_flat.reshape(N, Ho, Wo, C2)
    return jnp.transpose(out, (0, 3, 1, 2))


if __name__ == "__main__":
    # Conv(c1=4, c2=8, k=3, s=1) with autopad -> pad = 1 ("same").
    N, C1, H, W = 2, 4, 16, 16
    C2, K_SZ, STRIDE = 8, 3, 1
    PAD = K_SZ // 2  # autopad(k=3) = 1

    key = jax.random.PRNGKey(0)
    kx, kw, kg, kb, km, kv = jax.random.split(key, 6)

    x = jax.random.normal(kx, (N, C1, H, W), dtype=jnp.float32)
    # nn.Conv2d weight shape: [c2, c1, k, k], bias=False
    w = jax.random.normal(kw, (C2, C1, K_SZ, K_SZ), dtype=jnp.float32) * 0.1
    # BatchNorm2d parameters / running stats (eval mode).
    gamma = 1.0 + 0.1 * jax.random.normal(kg, (C2,), dtype=jnp.float32)
    beta = 0.1 * jax.random.normal(kb, (C2,), dtype=jnp.float32)
    run_mean = 0.1 * jax.random.normal(km, (C2,), dtype=jnp.float32)
    run_var = jnp.abs(jax.random.normal(kv, (C2,), dtype=jnp.float32)) + 0.5

    out = conv_bn_silu(x, w, gamma, beta, run_mean, run_var,
                       k=K_SZ, stride=STRIDE, pad=PAD)
    out = jax.block_until_ready(out)
    assert out.shape == (N, C2, H, W), out.shape

    eps = 1e-5
    scale = gamma / jnp.sqrt(run_var + eps)
    shift = beta - run_mean * scale

    def conv_ref(xx, ww):
        return jax.lax.conv_general_dilated(
            xx, ww, window_strides=(STRIDE, STRIDE),
            padding=((PAD, PAD), (PAD, PAD)),
            dimension_numbers=("NCHW", "OIHW", "NCHW"),
            precision=jax.lax.Precision.HIGHEST)

    # (1) Tight check: reference fed the same bf16-quantized operands the
    #     kernel consumes (BN scale already folded into the weights).
    w_eff = w * scale[:, None, None, None]
    x_q = x.astype(jnp.bfloat16).astype(jnp.float32)
    w_q = w_eff.astype(jnp.bfloat16).astype(jnp.float32)
    ref_q = conv_ref(x_q, w_q) + shift.reshape(1, C2, 1, 1)
    ref_q = ref_q * jax.nn.sigmoid(ref_q)
    err_q = float(jnp.max(jnp.abs(out - ref_q)))
    assert err_q < 2e-3, err_q

    # (2) Loose check against the exact f32 module math (gap = bf16 GEMM inputs,
    #     an intentional inference-precision tradeoff).
    ref32 = conv_ref(x, w) * scale.reshape(1, C2, 1, 1) + shift.reshape(1, C2, 1, 1)
    ref32 = ref32 * jax.nn.sigmoid(ref32)
    err32 = float(jnp.max(jnp.abs(out - ref32)))
    assert err32 < 5e-2, err32

    print("KERNEL_OK")
</pallas_src>

<mosaic_0001>
module attributes {stable_mosaic.version = 11 : i64} {
  func.func @_conv_bn_silu_kernel(%arg0: i32, %arg1: memref<2x18x128xbf16, #tpu.memory_space<vmem>>, %arg2: memref<384x128xbf16, #tpu.memory_space<vmem>>, %arg3: memref<1x128xf32, #tpu.memory_space<vmem>>, %arg4: memref<2x16x128xf32, #tpu.memory_space<vmem>>) attributes {dimension_semantics = [#tpu.dimension_semantics<parallel>], iteration_bounds = array<i64: 1>, scalar_prefetch = 0 : i64, scratch_operands = 0 : i64, tpu.core_type = #tpu.core_type<tc>, window_params = [{transform_indices = @transform_0, window_bounds = array<i64: 2, 18, 128>}, {pipeline_mode = #tpu.pipeline_mode<synchronous>, transform_indices = @transform_1, window_bounds = array<i64: 384, 128>}, {pipeline_mode = #tpu.pipeline_mode<synchronous>, transform_indices = @transform_2, window_bounds = array<i64: 1, 128>}, {transform_indices = @transform_3, window_bounds = array<i64: 2, 16, 128>}]} {
    %c0 = arith.constant 0 : index
    %c0_0 = arith.constant 0 : index
    %c0_1 = arith.constant 0 : index
    %0 = vector.load %arg1[%c0, %c0_0, %c0_1] : memref<2x18x128xbf16, #tpu.memory_space<vmem>>, vector<2x16x128xbf16>
    %c0_2 = arith.constant 0 : index
    %c1 = arith.constant 1 : index
    %c0_3 = arith.constant 0 : index
    %1 = vector.load %arg1[%c0_2, %c1, %c0_3] : memref<2x18x128xbf16, #tpu.memory_space<vmem>>, vector<2x16x128xbf16>
    %c0_4 = arith.constant 0 : index
    %c2 = arith.constant 2 : index
    %c0_5 = arith.constant 0 : index
    %2 = vector.load %arg1[%c0_4, %c2, %c0_5] : memref<2x18x128xbf16, #tpu.memory_space<vmem>>, vector<2x16x128xbf16>
    %3 = tpu.concatenate %0, %1, %2 in 2 : vector<2x16x128xbf16>, vector<2x16x128xbf16>, vector<2x16x128xbf16> -> vector<2x16x384xbf16>
    %4 = vector.shape_cast %3 : vector<2x16x384xbf16> to vector<32x384xbf16>
    %c0_6 = arith.constant 0 : index
    %c0_7 = arith.constant 0 : index
    %5 = vector.load %arg2[%c0_6, %c0_7] : memref<384x128xbf16, #tpu.memory_space<vmem>>, vector<384x128xbf16>
    %cst = arith.constant dense<0.000000e+00> : vector<32x128xf32>
    %6 = tpu.matmul %4, %5, %cst {dimension_numbers = #tpu.dot_dimension_numbers<[1], [0], [0], [1], [0, 0, 1, 1], [], []>} : vector<32x384xbf16>, vector<384x128xbf16>, vector<32x128xf32> -> vector<32x128xf32>
    %c0_8 = arith.constant 0 : index
    %c0_9 = arith.constant 0 : index
    %7 = vector.load %arg3[%c0_8, %c0_9] : memref<1x128xf32, #tpu.memory_space<vmem>>, vector<1x128xf32>
    %8 = vector.broadcast %7 : vector<1x128xf32> to vector<32x128xf32>
    %9 = arith.addf %6, %8 : vector<32x128xf32>
    %10 = arith.negf %9 : vector<32x128xf32>
    %11 = math.exp %10 : vector<32x128xf32>
    %cst_10 = arith.constant 1.000000e+00 : f32
    %12 = vector.broadcast %cst_10 : f32 to vector<32x128xf32>
    %13 = arith.addf %12, %11 : vector<32x128xf32>
    %14 = arith.divf %12, %13 : vector<32x128xf32>
    %15 = arith.mulf %9, %14 : vector<32x128xf32>
    %16 = vector.shape_cast %15 : vector<32x128xf32> to vector<2x16x128xf32>
    %c0_11 = arith.constant 0 : index
    %c0_12 = arith.constant 0 : index
    %c0_13 = arith.constant 0 : index
    %17 = vector.load %arg4[%c0_11, %c0_12, %c0_13] : memref<2x16x128xf32, #tpu.memory_space<vmem>>, vector<2x16x128xf32>
    tpu.vector_store %arg4[%c0_11, %c0_12, %c0_13], %16 {strides = array<i32>} : memref<2x16x128xf32, #tpu.memory_space<vmem>>, vector<2x16x128xf32>,
    return
  }
  func.func @transform_0(%arg0: i32) -> (i32, i32, i32) {
    %c0_i32 = arith.constant 0 : i32
    %c0_i32_0 = arith.constant 0 : i32
    %c0_i32_1 = arith.constant 0 : i32
    return %arg0, %c0_i32, %c0_i32_0 : i32, i32, i32
  }
  func.func @transform_1(%arg0: i32) -> (i32, i32) {
    %c0_i32 = arith.constant 0 : i32
    %c0_i32_0 = arith.constant 0 : i32
    %c0_i32_1 = arith.constant 0 : i32
    return %c0_i32, %c0_i32_0 : i32, i32
  }
  func.func @transform_2(%arg0: i32) -> (i32, i32) {
    %c0_i32 = arith.constant 0 : i32
    %c0_i32_0 = arith.constant 0 : i32
    %c0_i32_1 = arith.constant 0 : i32
    return %c0_i32, %c0_i32_0 : i32, i32
  }
  func.func @transform_3(%arg0: i32) -> (i32, i32, i32) {
    %c0_i32 = arith.constant 0 : i32
    %c0_i32_0 = arith.constant 0 : i32
    %c0_i32_1 = arith.constant 0 : i32
    return %arg0, %c0_i32, %c0_i32_0 : i32, i32, i32
  }
}

</mosaic_0001>

<bundles_post_ra>
// kernel: tile.8
= control target key start
LH: loop header
LB: loop body
LE: loop exit
PB: predicated region body
PF: predicated region fallthrough
CT: control target
= control target key end

     0   :  { %s28_s0 = inlined_call_operand.vmem [shape: f32[8], index: 0, kind: input, shape index: {}]   ;;  %s29_s1 = inlined_call_operand.vmem [shape: f32[16,8], index: 1, kind: output, shape index: {}]  }
   0x1   :  { %v4_v0 = vld [vmem:[%s28_s0] ss:$0 sm:$0xff] }
   0x2   :  { %5 = vst [vmem:[%s29_s1] sm:$0xff] %v4_v0 }
   0x3   :  { %8 = vst [vmem:[%s29_s1 + $0x8] sm:$0xff] %v4_v0 }

// kernel: tile.9
= control target key start
LH: loop header
LB: loop body
LE: loop exit
PB: predicated region body
PF: predicated region fallthrough
CT: control target
= control target key end

     0   :  { %s131_s10 = smov 120   ;;  %s132_s11 = smov 104   ;;  %vm3_vm0 = vcmask 64512   ;;  %vm9_vm1 = vcmask 1048512   ;;  %vm15_vm2 = vcmask 982912   ;;  %vm21_vm3 = vcmask 917312   ;;  %s207_s0 = inlined_call_operand.vmem [shape: f32[16,8], index: 0, kind: input, shape index: {}]   ;;  %s208_s1 = inlined_call_operand.vmem [shape: f32[1,128], index: 1, kind: output, shape index: {}]  }
   0x1   :  { %v101_v0 = vld [vmem:[%s207_s0 + $0xf] sm:$0x1]   ;;  %v103_v1 = vld [vmem:[%s207_s0 + $0xd] sm:$0x1]   ;;  %v105_v2 = vld [vmem:[%s207_s0 + $0xb] sm:$0x1]  }
   0x2   :  { %7 = vrot.lane.b32.xlu0 %v101_v0, %s131_s10  ;;  %19 = vrot.lane.b32.xlu1 %v103_v1, %s132_s11  ;;  %s133_s14 = smov 88   ;;  %v102_v3 = vld [vmem:[%s207_s0 + $0xe] sm:$0x1]   ;;  %v104_v4 = vld [vmem:[%s207_s0 + $0xc] sm:$0x1]   ;;  %s134_s19 = smov 112  }
   0x3   :  { %31 = vrot.lane.b32.xlu2 %v105_v2, %s133_s14  ;;  %s135_s20 = smov 96   ;;  %v106_v5 = vld [vmem:[%s207_s0 + $0xa] sm:$0x1]   ;;  %s136_s23 = smov 80   ;;  %v107_v6 = vld [vmem:[%s207_s0 + $0x9] sm:$0x1]  }
   0x4   :  { %v108_v7 = vld [vmem:[%s207_s0 + $0x8] sm:$0x1]   ;;  %s137_s28 = smov 72   ;;  %s138_s29 = smov 64   ;;  %v109_v8 = vld [vmem:[%s207_s0 + $0x7] sm:$0x1]  }
   0x5   :  { %s139_s3 = smov 56   ;;  %v110_v9 = vld [vmem:[%s207_s0 + $0x6] sm:$0x1]   ;;  %v111_v10 = vld [vmem:[%s207_s0 + $0x5] sm:$0x1]   ;;  %s140_s8 = smov 48  }
   0x6   :  { %s141_s9 = smov 40   ;;  %v112_v11 = vld [vmem:[%s207_s0 + $0x4] sm:$0x1]   ;;  %s142_s12 = smov 32   ;;  %v113_v12 = vld [vmem:[%s207_s0 + $0x3] sm:$0x1]  }
   0x7   :  { %v114_v13 = vld [vmem:[%s207_s0 + $0x2] sm:$0x1]   ;;  %s143_s17 = smov 24   ;;  %s144_s18 = smov 16   ;;  %v115_v14 = vld [vmem:[%s207_s0 + $0x1] sm:$0x1]  }
   0x8   :  { %s145_s21 = smov 8   ;;  %v2_v15 = vld [vmem:[%s207_s0] sm:$0x1]   ;;  %vm27_vm4 = vcmask 851712   ;;  %vm33_vm5 = vcmask 786112   ;;  %vm39_vm6 = vcmask 720512  }
   0x9   :  { %4 = vst.msk [vmem:[#allocation0] sm:$0x1] %vm3_vm0, %v2_v15   ;;  %vm45_vm7 = vcmask 654912   ;;  %vm51_vm8 = vcmask 589312   ;;  %vm57_vm9 = vcmask 523712   ;;  %vm63_vm10 = vcmask 458112  }
   0xa   :  { %13 = vrot.lane.b32.xlu0 %v102_v3, %s134_s19  ;;  %25 = vrot.lane.b32.xlu1 %v104_v4, %s135_s20  ;;  %vm69_vm11 = vcmask 392512   ;;  %vm75_vm12 = vcmask 326912   ;;  %vm81_vm13 = vcmask 261312   ;;  %vm87_vm14 = vcmask 195712  }
   0xb   :  { %37 = vrot.lane.b32.xlu2 %v106_v5, %s136_s23  ;;  %vm93_vm15 = vcmask 130112  }
  0x12   :  { %43 = vrot.lane.b32.xlu0 %v107_v6, %s137_s28  ;;  %49 = vrot.lane.b32.xlu1 %v108_v7, %s138_s29 }
  0x13   :  { %55 = vrot.lane.b32.xlu2 %v109_v8, %s139_s3 }
  0x1a   :  { %61 = vrot.lane.b32.xlu0 %v110_v9, %s140_s8  ;;  %67 = vrot.lane.b32.xlu1 %v111_v10, %s141_s9 }
  0x1b   :  { %73 = vrot.lane.b32.xlu2 %v112_v11, %s142_s12 }
  0x22   :  { %79 = vrot.lane.b32.xlu0 %v113_v12, %s143_s17  ;;  %85 = vrot.lane.b32.xlu1 %v114_v13, %s144_s18 }
  0x23   :  { %91 = vrot.lane.b32.xlu2 %v115_v14, %s145_s21 }
  0x5d   :  { %v32_v16 = vpop.permute.xlu2 %31  }
  0x65   :  { %v38_v17 = vpop.permute.xlu2 %37  }
  0x6d   :  { %v56_v18 = vpop.permute.xlu2 %55  }
  0x74   :  { %v8_v19 = vpop.permute.xlu0 %7   ;;  %v20_v20 = vpop.permute.xlu1 %19  }
  0x75   :  { %10 = vst.msk [vmem:[#allocation0] sm:$0x1] %vm9_vm1, %v8_v19   ;;  %v74_v21 = vpop.permute.xlu2 %73  }
  0x7c   :  { %v14_v22 = vpop.permute.xlu0 %13   ;;  %v26_v23 = vpop.permute.xlu1 %25  }
  0x7d   :  { %16 = vst.msk [vmem:[#allocation0] sm:$0x1] %vm15_vm2, %v14_v22   ;;  %v92_v24 = vpop.permute.xlu2 %91  }
  0x7e   :  { %22 = vst.msk [vmem:[#allocation0] sm:$0x1] %vm21_vm3, %v20_v20  }
  0x7f   :  { %28 = vst.msk [vmem:[#allocation0] sm:$0x1] %vm27_vm4, %v26_v23  }
  0x80   :  { %34 = vst.msk [vmem:[#allocation0] sm:$0x1] %vm33_vm5, %v32_v16  }
  0x81   :  { %40 = vst.msk [vmem:[#allocation0] sm:$0x1] %vm39_vm6, %v38_v17  }
  0x84   :  { %v44_v25 = vpop.permute.xlu0 %43   ;;  %v50_v26 = vpop.permute.xlu1 %49  }
  0x85   :  { %46 = vst.msk [vmem:[#allocation0] sm:$0x1] %vm45_vm7, %v44_v25  }
  0x86   :  { %52 = vst.msk [vmem:[#allocation0] sm:$0x1] %vm51_vm8, %v50_v26  }
  0x87   :  { %58 = vst.msk [vmem:[#allocation0] sm:$0x1] %vm57_vm9, %v56_v18  }
  0x8c   :  { %v62_v27 = vpop.permute.xlu0 %61   ;;  %v68_v28 = vpop.permute.xlu1 %67  }
  0x8d   :  { %64 = vst.msk [vmem:[#allocation0] sm:$0x1] %vm63_vm10, %v62_v27  }
  0x8e   :  { %70 = vst.msk [vmem:[#allocation0] sm:$0x1] %vm69_vm11, %v68_v28  }
  0x8f   :  { %76 = vst.msk [vmem:[#allocation0] sm:$0x1] %vm75_vm12, %v74_v21  }
  0x94   :  { %v80_v29 = vpop.permute.xlu0 %79   ;;  %v86_v30 = vpop.permute.xlu1 %85  }
  0x95   :  { %82 = vst.msk [vmem:[#allocation0] sm:$0x1] %vm81_vm13, %v80_v29  }
  0x96   :  { %88 = vst.msk [vmem:[#allocation0] sm:$0x1] %vm87_vm14, %v86_v30  }
  0x97   :  { %94 = vst.msk [vmem:[#allocation0] sm:$0x1] %vm93_vm15, %v92_v24  }
  0x9e   :  { %v97_v31 = vld [vmem:[#allocation0] sm:$0x1] }
  0x9f   :  { %100 = vst [vmem:[%s208_s1] sm:$0x1] %v97_v31 }

// kernel: conv_bn_silu.1
= control target key start
LH: loop header
LB: loop body
LE: loop exit
PB: predicated region body
PF: predicated region fallthrough
CT: control target
= control target key end

     0   :  { %vm40_vm0 = vsmask.f32 7424  ;;  %vm73_vm1 = vcmask 1046528   ;;  %s725_s1 = inlined_call_operand.vmem [shape: bf16[384,128], index: 1, kind: input, shape index: {}]   ;;  %s726_s0 = inlined_call_operand.vmem [shape: bf16[2,18,128], index: 0, kind: input, shape index: {}]   ;;  %s727_s2 = inlined_call_operand.vmem [shape: f32[1,128], index: 2, kind: input, shape index: {}]   ;;  %s728_s3 = inlined_call_operand.vmem [shape: f32[2,16,128], index: 3, kind: output, shape index: {}]  }
   0x1   :  { %v530_v0 = vld [vmem:[%s725_s1 + $0x38] sm:$0xff]  ;;  %v529_v3 = vld [vmem:[%s725_s1 + $0x30] sm:$0xff]  ;;  %v528_v6 = vld [vmem:[%s725_s1 + $0x28] sm:$0xff] }
   0x2   :  { %v538_v1 = vld [vmem:[%s725_s1 + $0x78] sm:$0xff]  ;;  %278 = vmatpush.bf16.msra.mxu0 %v530_v0  ;;  %v537_v4 = vld [vmem:[%s725_s1 + $0x70] sm:$0xff]  ;;  %554 = vmatpush.bf16.msra.mxu3 %v530_v0  ;;  %v536_v7 = vld [vmem:[%s725_s1 + $0x68] sm:$0xff] }
   0x3   :  { %v546_v2 = vld [vmem:[%s725_s1 + $0xb8] sm:$0xff]  ;;  %297 = vmatpush.bf16.msra.mxu1 %v538_v1  ;;  %v545_v5 = vld [vmem:[%s725_s1 + $0xb0] sm:$0xff]  ;;  %v544_v8 = vld [vmem:[%s725_s1 + $0xa8] sm:$0xff] }
   0x4   :  { %316 = vmatpush.bf16.msra.mxu2 %v546_v2  ;;  %v527_v9 = vld [vmem:[%s725_s1 + $0x20] sm:$0xff]  ;;  %v18_v12 = vld [vmem:[%s726_s0 + $0x8] sm:$0x1]  ;;  %v526_v13 = vld [vmem:[%s725_s1 + $0x18] sm:$0xff] }
   0x5   :  { %v535_v10 = vld [vmem:[%s725_s1 + $0x60] sm:$0xff]  ;;  %v534_v14 = vld [vmem:[%s725_s1 + $0x58] sm:$0xff]  ;;  %v36_v15 = vunpack.c.l.b16 %v18_v12  ;;  %v525_v18 = vld [vmem:[%s725_s1 + $0x10] sm:$0xff] }
   0x6   :  { %279 = vmatpush.bf16.msra.mxu0 %v529_v3  ;;  %555 = vmatpush.bf16.msra.mxu3 %v529_v3  ;;  %v543_v11 = vld [vmem:[%s725_s1 + $0xa0] sm:$0xff]  ;;  %v542_v16 = vld [vmem:[%s725_s1 + $0x98] sm:$0xff]  ;;  %v533_v19 = vld [vmem:[%s725_s1 + $0x50] sm:$0xff] }
   0x7   :  { %298 = vmatpush.bf16.msra.mxu1 %v537_v4  ;;  %v548_v17 = vld [vmem:[%s726_s0] sm:$0xff]   ;;  %v38_v21 = vpack.c.b16 %v36_v15, %v36_v15  ;;  %v541_v22 = vld [vmem:[%s725_s1 + $0x90] sm:$0xff]  ;;  %v524_v25 = vld [vmem:[%s725_s1 + $0x8] sm:$0xff] }
   0x8   :  { %317 = vmatpush.bf16.msra.mxu2 %v545_v5  ;;  %v44_v20 = vshll.u32 %v548_v17, 16  ;;  %v551_v23 = vld [vmem:[%s726_s0] sm:$0xf0]  ;;  %v552_v24 = vld [vmem:[%s726_s0] sm:$0xe]  ;;  %v532_v26 = vld [vmem:[%s725_s1 + $0x48] sm:$0xff] }
   0x9   :  { %v42_v27 = vshrl.u32 %v548_v17, 16  ;;  %v49_v29 = vshll.u32 %v38_v21, 16  ;;  %v540_v30 = vld [vmem:[%s725_s1 + $0x88] sm:$0xff]  ;;  %v553_v31 = vor.u32 %v552_v24, %v551_v23  ;;  %v579_v33 = vld [vmem:[%s726_s0 + $0xc] sm:$0xf0]  ;;  %v523_v34 = vld [vmem:[%s725_s1] sm:$0xff] }
   0xa   :  { %280 = vmatpush.bf16.msra.mxu0 %v528_v6  ;;  %556 = vmatpush.bf16.msra.mxu3 %v528_v6  ;;  %v46_v28 = vrot.slane %v44_v20, 1  ;;  %v16_v32 = vld [vmem:[%s726_s0 + $0xc] sm:$0xff]   ;;  %v531_v35 = vld [vmem:[%s725_s1 + $0x40] sm:$0xff]  ;;  %v75_v40 = vrot.slane %v38_v21, 1  ;;  %v19_v41 = vld [vmem:[%s726_s0 + $0x14] sm:$0x1] }
   0xb   :  { %299 = vmatpush.bf16.msra.mxu1 %v536_v7  ;;  %v51_v37 = vrot.slane %v49_v29, 1  ;;  %v539_v38 = vld [vmem:[%s725_s1 + $0x80] sm:$0xff]  ;;  %v74_v39 = vrot.slane %v553_v31, 1  ;;  %v37_v43 = vunpack.c.l.b16 %v19_v41  ;;  %v580_v45 = vld [vmem:[%s726_s0 + $0xc] sm:$0xe]  ;;  %v56_v47 = vshll.u32 %v16_v32, 16 }
   0xc   :  { %318 = vmatpush.bf16.msra.mxu2 %v544_v8  ;;  %v47_v36 = vor.u32 %v46_v28, %v42_v27  ;;  %v54_v48 = vshrl.u32 %v16_v32, 16  ;;  %v581_v51 = vor.u32 %v580_v45, %v579_v33  ;;  %v562_v58 = vld [vmem:[%s727_s2] ss:$0 sm:$0xff] }
   0xd   :  { %v76_v44 = vsel %vm73_vm1, %v74_v39, %v75_v40  ;;  %v39_v46 = vpack.c.b16 %v37_v43, %v37_v43  ;;  %v58_v49 = vrot.slane %v56_v47, 1 }
   0xe   :  { %281 = vmatpush.bf16.msra.mxu0 %v527_v9  ;;  %557 = vmatpush.bf16.msra.mxu3 %v527_v9  ;;  %v52_v42 = vsel %vm40_vm0, %v47_v36, %v51_v37  ;;  %v77_v54 = vrot.slane %v581_v51, 1 }
   0xf   :  { %300 = vmatpush.bf16.msra.mxu1 %v535_v10  ;;  %v61_v50 = vshll.u32 %v39_v46, 16  ;;  %v59_v52 = vor.u32 %v58_v49, %v54_v48  ;;  %v78_v55 = vrot.slane %v39_v46, 1 }
  0x10   :  { %319 = vmatpush.bf16.msra.mxu2 %v543_v11 }
  0x11   :  { %v63_v53 = vrot.slane %v61_v50, 1  ;;  %v79_v57 = vsel %vm73_vm1, %v77_v54, %v78_v55 }
  0x12   :  { %282 = vmatpush.bf16.msra.mxu0 %v526_v13  ;;  %558 = vmatpush.bf16.msra.mxu3 %v526_v13 }
  0x13   :  { %301 = vmatpush.bf16.msra.mxu1 %v534_v14  ;;  %v64_v56 = vsel %vm40_vm0, %v59_v52, %v63_v53 }
  0x14   :  { %320 = vmatpush.bf16.msra.mxu2 %v542_v16 }
  0x16   :  { %283 = vmatpush.bf16.msra.mxu0 %v525_v18  ;;  %559 = vmatpush.bf16.msra.mxu3 %v525_v18 }
  0x17   :  { %302 = vmatpush.bf16.msra.mxu1 %v533_v19 }
  0x18   :  { %321 = vmatpush.bf16.msra.mxu2 %v541_v22 }
  0x1a   :  { %284 = vmatpush.bf16.msra.mxu0 %v524_v25  ;;  %560 = vmatpush.bf16.msra.mxu3 %v524_v25 }
  0x1b   :  { %303 = vmatpush.bf16.msra.mxu1 %v532_v26 }
  0x1c   :  { %322 = vmatpush.bf16.msra.mxu2 %v540_v30 }
  0x1e   :  { %285 = vmatpush.bf16.msra.mxu0 %v523_v34  ;;  %561 = vmatpush.bf16.msra.mxu3 %v523_v34 }
  0x1f   :  { %304 = vmatpush.bf16.msra.mxu1 %v531_v35 }
  0x20   :  { %323 = vmatpush.bf16.msra.mxu2 %v539_v38 }
  0x21   :  { %286 = vmatmul.bf16.vlgmr.msra.gmra.mxu0 %v548_v17  ;;  %291 = vmatmul.bf16.vlgmr.msra.gmra.mxu3 %v16_v32 }
  0x22   :  { %305 = vmatmul.bf16.vlgmr.msra.gmra.mxu1 %v52_v42 }
  0x23   :  { %324 = vmatmul.bf16.vlgmr.msra.gmra.mxu2 %v76_v44 }
  0x32   :  { %310 = vmatmul.bf16.gmra.mxu1 %v64_v56 }
  0x33   :  { %329 = vmatmul.bf16.gmra.mxu2 %v79_v57 }
  0x9e   :  { %v287_v59 = vpop.f32.mrf.mxu0 }
  0x9f   :  { %v306_v60 = vpop.f32.mrf.mxu1  ;;  %v288_v61 = vadd.f32 %v562_v58, %v287_v59 }
  0xa1   :  { %v307_v62 = vadd.f32 %v306_v60, %v288_v61 }
  0xa4   :  { %v292_v6 = vpop.f32.mrf.mxu3 }
  0xa5   :  { %v293_v8 = vadd.f32 %v562_v58, %v292_v6 }
  0xa6   :  { %v325_v63 = vpop.f32.mrf.mxu2  ;;  %v289_v1 = vpop.f32.mrf.mxu0 }
  0xa7   :  { %v326_v0 = vadd.f32 %v325_v63, %v307_v62  ;;  %v308_v2 = vpop.f32.mrf.mxu1  ;;  %v290_v4 = vadd.f32 %v562_v58, %v289_v1 }
  0xa9   :  { %v519_v3 = vmul.f32 -1.442695, %v326_v0  ;;  %v309_v5 = vadd.f32 %v308_v2, %v290_v4 }
  0xab   :  { %563 = vpow2.f32 %v519_v3 }
  0xac   :  { %v294_v17 = vpop.f32.mrf.mxu3 }
  0xad   :  { %v295_v24 = vadd.f32 %v562_v58, %v294_v17 }
  0xae   :  { %v327_v7 = vpop.f32.mrf.mxu2 }
  0xaf   :  { %v328_v9 = vadd.f32 %v327_v7, %v309_v5  ;;  %v311_v10 = vpop.f32.mrf.mxu1 }
  0xb0   :  { %v312_v14 = vadd.f32 %v311_v10, %v293_v8 }
  0xb1   :  { %v564_v11 = vpop.eup %563  ;;  %v520_v12 = vmul.f32 -1.442695, %v328_v9 }
  0xb2   :  { %v347_v13 = vadd.f32 1.0, %v564_v11 }
  0xb3   :  { %565 = vpow2.f32 %v520_v12 }
  0xb4   :  { %567 = vrcp.f32 %v347_v13  ;;  %v362_v27 = vand.u32 2147483648, %v347_v13  ;;  %v360_v30 = vand.u32 2147483647, %v347_v13  ;;  %vm356_vm3 = vweird.f32 %v347_v13 }
  0xb6   :  { %v330_v15 = vpop.f32.mrf.mxu2  ;;  %v363_v36 = vor.u32 1.1754944e-38, %v362_v27  ;;  %vm361_vm5 = vcmp.eq.f32.partialorder %v360_v30, 8.507059e+37 }
  0xb7   :  { %v705_v16 = vadd.f32 %v330_v15, %v312_v14  ;;  %v313_v22 = vpop.f32.mrf.mxu1 }
  0xb8   :  { %v314_v26 = vadd.f32 %v313_v22, %v295_v24 }
  0xb9   :  { %v566_v18 = vpop.eup %565  ;;  %v521_v19 = vmul.f32 -1.442695, %v705_v16 }
  0xba   :  { %v568_v20 = vpop.eup %567  ;;  %v348_v21 = vadd.f32 1.0, %v566_v18 }
  0xbb   :  { %v352_v23 = vmul.f32 %v568_v20, %v347_v13  ;;  %569 = vpow2.f32 %v521_v19  ;;  %vm357_vm2 = vweird.f32 %v568_v20 }
  0xbc   :  { %571 = vrcp.f32 %v348_v21  ;;  %vm358_vm4 = vmor %vm356_vm3, %vm357_vm2  ;;  %v377_v43 = vand.u32 2147483648, %v348_v21  ;;  %v375_v45 = vand.u32 2147483647, %v348_v21  ;;  %vm371_vm7 = vweird.f32 %v348_v21 }
  0xbd   :  { %v353_v25 = vsub.f32 1.0, %v352_v23 }
  0xbe   :  { %v332_v28 = vpop.f32.mrf.mxu2  ;;  %v378_v49 = vor.u32 1.1754944e-38, %v377_v43  ;;  %vm376_vm9 = vcmp.eq.f32.partialorder %v375_v45, 8.507059e+37 }
  0xbf   :  { %v354_v29 = vmul.f32 %v568_v20, %v353_v25  ;;  %v708_v31 = vadd.f32 %v332_v28, %v314_v26 }
  0xc1   :  { %v570_v32 = vpop.eup %569  ;;  %v355_v33 = vadd.f32 %v568_v20, %v354_v29  ;;  %v522_v34 = vmul.f32 -1.442695, %v708_v31 }
  0xc2   :  { %v572_v35 = vpop.eup %571  ;;  %v349_v37 = vadd.f32 1.0, %v570_v32 }
  0xc3   :  { %v359_v38 = vsel %vm358_vm4, %v568_v20, %v355_v33  ;;  %v367_v39 = vmul.f32 %v572_v35, %v348_v21  ;;  %573 = vpow2.f32 %v522_v34  ;;  %vm372_vm6 = vweird.f32 %v572_v35 }
  0xc4   :  { %v364_v40 = vsel %vm361_vm5, %v363_v36, %v359_v38  ;;  %575 = vrcp.f32 %v349_v37  ;;  %vm373_vm8 = vmor %vm371_vm7, %vm372_vm6  ;;  %v392_v56 = vand.u32 2147483648, %v349_v37  ;;  %v390_v58 = vand.u32 2147483647, %v349_v37 }
  0xc5   :  { %v411_v41 = vmul.f32 %v364_v40, %v326_v0  ;;  %v368_v42 = vsub.f32 1.0, %v367_v39  ;;  %vm386_vm11 = vweird.f32 %v349_v37 }
  0xc6   :  { %v393_v61 = vor.u32 1.1754944e-38, %v392_v56  ;;  %vm391_vm13 = vcmp.eq.f32.partialorder %v390_v58, 8.507059e+37 }
  0xc7   :  { %415 = vst [vmem:[%s728_s3] sm:$0xff] %v411_v41  ;;  %v369_v44 = vmul.f32 %v572_v35, %v368_v42 }
  0xc9   :  { %v574_v46 = vpop.eup %573  ;;  %v370_v47 = vadd.f32 %v572_v35, %v369_v44 }
  0xca   :  { %v576_v48 = vpop.eup %575  ;;  %v350_v50 = vadd.f32 1.0, %v574_v46 }
  0xcb   :  { %v374_v51 = vsel %vm373_vm8, %v572_v35, %v370_v47  ;;  %v382_v52 = vmul.f32 %v576_v48, %v349_v37  ;;  %vm387_vm10 = vweird.f32 %v576_v48 }
  0xcc   :  { %v379_v53 = vsel %vm376_vm9, %v378_v49, %v374_v51  ;;  %577 = vrcp.f32 %v350_v50  ;;  %vm388_vm12 = vmor %vm386_vm11, %vm387_vm10  ;;  %v407_v3 = vand.u32 2147483648, %v350_v50  ;;  %v405_v5 = vand.u32 2147483647, %v350_v50 }
  0xcd   :  { %v412_v54 = vmul.f32 %v379_v53, %v328_v9  ;;  %v383_v55 = vsub.f32 1.0, %v382_v52  ;;  %vm401_vm15 = vweird.f32 %v350_v50 }
  0xce   :  { %v408_v7 = vor.u32 1.1754944e-38, %v407_v3  ;;  %vm406_vm1 = vcmp.eq.f32.partialorder %v405_v5, 8.507059e+37 }
  0xcf   :  { %416 = vst [vmem:[%s728_s3 + $0x8] sm:$0xff] %v412_v54  ;;  %v384_v57 = vmul.f32 %v576_v48, %v383_v55 }
  0xd1   :  { %v385_v59 = vadd.f32 %v576_v48, %v384_v57 }
  0xd2   :  { %v578_v60 = vpop.eup %577 }
  0xd3   :  { %v389_v62 = vsel %vm388_vm12, %v576_v48, %v385_v59  ;;  %v397_v63 = vmul.f32 %v578_v60, %v350_v50  ;;  %vm402_vm14 = vweird.f32 %v578_v60 }
  0xd4   :  { %v394_v0 = vsel %vm391_vm13, %v393_v61, %v389_v62  ;;  %vm403_vm0 = vmor %vm401_vm15, %vm402_vm14 }
  0xd5   :  { %v413_v1 = vmul.f32 %v394_v0, %v705_v16  ;;  %v398_v2 = vsub.f32 1.0, %v397_v63 }
  0xd7   :  { %417 = vst [vmem:[%s728_s3 + $0x10] sm:$0xff] %v413_v1  ;;  %v399_v4 = vmul.f32 %v578_v60, %v398_v2 }
  0xd9   :  { %v400_v6 = vadd.f32 %v578_v60, %v399_v4 }
  0xdb   :  { %v404_v8 = vsel %vm403_vm0, %v578_v60, %v400_v6 }
  0xdc   :  { %v409_v9 = vsel %vm406_vm1, %v408_v7, %v404_v8 }
  0xdd   :  { %v414_v10 = vmul.f32 %v409_v9, %v708_v31 }
  0xdf   :  { %418 = vst [vmem:[%s728_s3 + $0x18] sm:$0xff] %v414_v10 }

</bundles_post_ra>
